<compile_context>
chip_gen: v6e
topology: v6e:2x2x1
jax: 0.10.0
libtpu: 0.0.40
codegen_flags: <defaults>
</compile_context>

<pallas_src>
import functools

import jax
import jax.numpy as jnp
import numpy as np
from jax import lax
from jax.experimental import pallas as pl
from jax.experimental.pallas import tpu as pltpu

# ----------------------------- hyperparameters ------------------------------
N_EMBD = 32          # n_embd
NUM_HEADS = 4        # num_heads
HEAD_SIZE = N_EMBD // NUM_HEADS
BLOCK_SIZE = 8       # block_size (== T used below)
BATCH = 2
SEQ = 8              # T  (T <= block_size)
LN_EPS = 1e-5
NEG_INF = -1e30      # large finite negative (safer than -inf)


def _layer_norm(z, w, b):
    mu = jnp.mean(z, axis=-1, keepdims=True)
    var = jnp.mean((z - mu) ** 2, axis=-1, keepdims=True)
    return (z - mu) * lax.rsqrt(var + LN_EPS) * w + b


# ------------------------------- Pallas kernel ------------------------------
def transformer_block_kernel(
    x_ref,                               # (B*T, C)   f32
    w_attn_ref,                          # (C, 4C)    bf16 : [:, :3C]=Wqkv (q pre-scaled), [:, 3C:]=Wproj
    w1_ref,                              # (C, 4C)    bf16
    w2_ref,                              # (4C, C)    bf16
    p_ref,                               # (16, 128)  f32 packed vectors + causal mask bias
    out_ref,                             # (B*T, C)   f32
    *, batch, seq, n_embd, num_heads,
):
    B, T, C, H = batch, seq, n_embd, num_heads
    hs = C // H

    x = x_ref[...]                       # (N, C) f32
    pv = p_ref[...]                      # (16, 128) f32

    # packed parameter slab (static row / lane slices)
    ln1w = pv[0:1, 0:C]
    ln1b = pv[1:2, 0:C]
    ln2w = pv[2:3, 0:C]
    ln2b = pv[3:4, 0:C]
    bproj = pv[4:5, 0:C]
    b2 = pv[5:6, 0:C]
    b1 = pv[6:7, 0:4 * C]
    mask_bias = pv[8:8 + T, 0:T].reshape(1, T, T)     # additive 0 / -1e30

    # ---- LayerNorm 1 (f32) ----
    xn = _layer_norm(x, ln1w, ln1b)

    # ---- fused QKV projection: one MXU push, f32 accumulation ----
    w_qkv = w_attn_ref[:, 0:3 * C]                    # (C, 3C) bf16
    w_proj = w_attn_ref[:, 3 * C:4 * C]               # (C, C)  bf16
    qkv = jnp.dot(xn.astype(jnp.bfloat16), w_qkv,
                  preferred_element_type=jnp.float32)             # (N, 3C) f32
    qkv = qkv.reshape(B, T, 3 * C)

    # ---- head split: static 8-wide lane slices, merged (B*H) batch axis ----
    def split_heads(off):
        parts = [qkv[:, :, off + h * hs: off + (h + 1) * hs] for h in range(H)]
        return jnp.stack(parts, axis=1).reshape(B * H, T, hs)      # (BH, T, hs)

    q = split_heads(0).astype(jnp.bfloat16)           # scale folded into Wq host-side
    k = split_heads(C).astype(jnp.bfloat16)
    v = split_heads(2 * C).astype(jnp.bfloat16)

    # ---- causal attention, batched over B*H ----
    s = jnp.einsum('nqd,nkd->nqk', q, k,
                   preferred_element_type=jnp.float32)             # (BH, T, T)
    s = s + mask_bias
    m = jnp.max(s, axis=-1, keepdims=True)
    e = jnp.exp(s - m)
    probs = e * pl.reciprocal(jnp.sum(e, axis=-1, keepdims=True), approx=True)

    o = jnp.einsum('nqk,nkd->nqd', probs.astype(jnp.bfloat16), v,
                   preferred_element_type=jnp.float32)             # (BH, T, hs)

    # ---- head concat (lanes) + single output projection ----
    o4 = o.reshape(B, H, T, hs)
    o_cat = jnp.concatenate([o4[:, h] for h in range(H)], axis=-1)  # (B, T, C)
    o_cat = o_cat.reshape(B * T, C)
    att = jnp.dot(o_cat.astype(jnp.bfloat16), w_proj,
                  preferred_element_type=jnp.float32)               # (N, C)

    y = x + att + bproj                  # residual 1 (+ projection bias)

    # ---- LayerNorm 2 + FeedForward: Linear -> ReLU -> Linear ----
    yn = _layer_norm(y, ln2w, ln2b)
    h1 = jnp.dot(yn.astype(jnp.bfloat16), w1_ref[...],
                 preferred_element_type=jnp.float32) + b1
    h1 = jnp.maximum(h1, 0.0)
    h2 = jnp.dot(h1.astype(jnp.bfloat16), w2_ref[...],
                 preferred_element_type=jnp.float32) + b2

    out_ref[...] = y + h2                # residual 2


# ------------------------------ param preparation ---------------------------
def prepare_params(p):
    """One-time host-side restructuring:
       * W_attn = [wq*scale | wk | wv | wproj]  (C, 4C) bf16
       * f32 vectors + additive causal-mask bias packed into one (16,128) slab
    """
    C, T = N_EMBD, BLOCK_SIZE
    scale = C ** (-0.5)                  # PyTorch Head scales by n_embd**-0.5
    w_qkv = jnp.concatenate([p["wq"] * scale, p["wk"], p["wv"]], axis=1)   # (C, 3C)
    w_attn = jnp.concatenate([w_qkv, p["wproj"]], axis=1).astype(jnp.bfloat16)  # (C, 4C)

    pslab = jnp.zeros((16, 128), jnp.float32)
    pslab = pslab.at[0, :C].set(p["ln1w"].reshape(-1))
    pslab = pslab.at[1, :C].set(p["ln1b"].reshape(-1))
    pslab = pslab.at[2, :C].set(p["ln2w"].reshape(-1))
    pslab = pslab.at[3, :C].set(p["ln2b"].reshape(-1))
    pslab = pslab.at[4, :C].set(p["bproj"].reshape(-1))
    pslab = pslab.at[5, :C].set(p["b2"].reshape(-1))
    pslab = pslab.at[6, :4 * C].set(p["b1"].reshape(-1))
    tril = jnp.tril(jnp.ones((T, T), bool))
    mask_bias = jnp.where(tril, 0.0, NEG_INF).astype(jnp.float32)
    pslab = pslab.at[8:8 + T, :T].set(mask_bias)

    return {
        "w_attn": w_attn,
        "w1": p["w1"].astype(jnp.bfloat16),
        "w2": p["w2"].astype(jnp.bfloat16),
        "pslab": pslab,
    }


# ------------------------------- host wrapper -------------------------------
def transformer_block(x, prepped):
    B, T, C = x.shape
    kernel = functools.partial(transformer_block_kernel,
                               batch=B, seq=T, n_embd=C, num_heads=NUM_HEADS)
    out = pl.pallas_call(
        kernel,
        out_shape=jax.ShapeDtypeStruct((B * T, C), jnp.float32),
        in_specs=[pl.BlockSpec(memory_space=pltpu.MemorySpace.VMEM)
                  for _ in range(5)],
        out_specs=pl.BlockSpec(memory_space=pltpu.MemorySpace.VMEM),
    )(
        x.reshape(B * T, C),
        prepped["w_attn"], prepped["w1"], prepped["w2"], prepped["pslab"],
    )
    return out.reshape(B, T, C)


# ----------------------------- pure-JAX reference ---------------------------
def reference_block(x, p):
    def ln(z, w, b):
        mu = jnp.mean(z, axis=-1, keepdims=True)
        var = jnp.mean((z - mu) ** 2, axis=-1, keepdims=True)
        return (z - mu) / jnp.sqrt(var + LN_EPS) * w + b

    B, T, C = x.shape
    xn = ln(x, p["ln1w"], p["ln1b"])
    q = xn @ p["wq"]
    k = xn @ p["wk"]
    v = xn @ p["wv"]
    outs = []
    mask = jnp.tril(jnp.ones((T, T), bool))
    for h in range(NUM_HEADS):
        lo = h * HEAD_SIZE
        qh, kh, vh = (a[..., lo:lo + HEAD_SIZE] for a in (q, k, v))
        s = jnp.einsum("btd,bsd->bts", qh, kh) * C ** (-0.5)
        s = jnp.where(mask, s, -jnp.inf)
        w = jax.nn.softmax(s, axis=-1)
        outs.append(jnp.einsum("bts,bsd->btd", w, vh))
    attn = jnp.concatenate(outs, axis=-1)
    y = x + attn @ p["wproj"] + p["bproj"]
    yn = ln(y, p["ln2w"], p["ln2b"])
    ff = jnp.maximum(yn @ p["w1"] + p["b1"], 0.0) @ p["w2"] + p["b2"]
    return y + ff


# ------------------------------------ main -----------------------------------
if __name__ == "__main__":
    key = jax.random.PRNGKey(0)
    ks = jax.random.split(key, 10)
    C = N_EMBD

    def init(k, fan_in, shape):
        bound = 1.0 / np.sqrt(fan_in)
        return jax.random.uniform(k, shape, jnp.float32, -bound, bound)

    params = {
        # attention projections, stored as (in, out) so reference does x @ W
        "wq": init(ks[0], C, (C, C)),
        "wk": init(ks[1], C, (C, C)),
        "wv": init(ks[2], C, (C, C)),
        "wproj": init(ks[3], C, (C, C)),
        "bproj": init(ks[4], C, (1, C)),
        # LayerNorm defaults (PyTorch): weight=1, bias=0
        "ln1w": jnp.ones((1, C), jnp.float32),
        "ln1b": jnp.zeros((1, C), jnp.float32),
        "ln2w": jnp.ones((1, C), jnp.float32),
        "ln2b": jnp.zeros((1, C), jnp.float32),
        # FFN
        "w1": init(ks[5], C, (C, 4 * C)),
        "b1": init(ks[6], C, (1, 4 * C)),
        "w2": init(ks[7], 4 * C, (4 * C, C)),
        "b2": init(ks[8], 4 * C, (1, C)),
    }

    x = jax.random.normal(ks[9], (BATCH, SEQ, C), jnp.float32)

    prepped = prepare_params(params)     # one-time host-side restructure / bf16 cast
    out = jax.block_until_ready(transformer_block(x, prepped))

    ref = jax.block_until_ready(reference_block(x, params))
    # bf16 matmul operands + approx reciprocal -> relaxed tolerance vs. f32 ref
    np.testing.assert_allclose(np.asarray(out), np.asarray(ref),
                               rtol=2e-2, atol=3e-2)
    print("KERNEL_OK")
</pallas_src>

<mosaic_0001>
module attributes {stable_mosaic.version = 11 : i64} {
  func.func @transformer_block_kernel(%arg0: memref<16x32xf32, #tpu.memory_space<vmem>>, %arg1: memref<32x128xbf16, #tpu.memory_space<vmem>>, %arg2: memref<32x128xbf16, #tpu.memory_space<vmem>>, %arg3: memref<128x32xbf16, #tpu.memory_space<vmem>>, %arg4: memref<16x128xf32, #tpu.memory_space<vmem>>, %arg5: memref<16x32xf32, #tpu.memory_space<vmem>>) attributes {dimension_semantics = [], scalar_prefetch = 0 : i64, scratch_operands = 0 : i64, tpu.core_type = #tpu.core_type<tc>} {
    %c0 = arith.constant 0 : index
    %c0_0 = arith.constant 0 : index
    %0 = vector.load %arg0[%c0, %c0_0] : memref<16x32xf32, #tpu.memory_space<vmem>>, vector<16x32xf32>
    %c0_1 = arith.constant 0 : index
    %c0_2 = arith.constant 0 : index
    %1 = vector.load %arg4[%c0_1, %c0_2] : memref<16x128xf32, #tpu.memory_space<vmem>>, vector<16x128xf32>
    %2 = vector.extract_strided_slice %1 {offsets = [0, 0], sizes = [1, 32], strides = [1, 1]} : vector<16x128xf32> to vector<1x32xf32>
    %3 = vector.extract_strided_slice %1 {offsets = [1, 0], sizes = [1, 32], strides = [1, 1]} : vector<16x128xf32> to vector<1x32xf32>
    %4 = vector.extract_strided_slice %1 {offsets = [2, 0], sizes = [1, 32], strides = [1, 1]} : vector<16x128xf32> to vector<1x32xf32>
    %5 = vector.extract_strided_slice %1 {offsets = [3, 0], sizes = [1, 32], strides = [1, 1]} : vector<16x128xf32> to vector<1x32xf32>
    %6 = vector.extract_strided_slice %1 {offsets = [4, 0], sizes = [1, 32], strides = [1, 1]} : vector<16x128xf32> to vector<1x32xf32>
    %7 = vector.extract_strided_slice %1 {offsets = [5, 0], sizes = [1, 32], strides = [1, 1]} : vector<16x128xf32> to vector<1x32xf32>
    %8 = vector.extract_strided_slice %1 {offsets = [6, 0], sizes = [1, 128], strides = [1, 1]} : vector<16x128xf32> to vector<1x128xf32>
    %9 = vector.extract_strided_slice %1 {offsets = [8, 0], sizes = [8, 8], strides = [1, 1]} : vector<16x128xf32> to vector<8x8xf32>
    %10 = vector.shape_cast %9 : vector<8x8xf32> to vector<1x8x8xf32>
    %cst = arith.constant dense<0.000000e+00> : vector<16xf32>
    %11 = vector.multi_reduction <add>, %0, %cst [1] : vector<16x32xf32> to vector<16xf32>
    %12 = vector.shape_cast %11 : vector<16xf32> to vector<16x1xf32>
    %cst_3 = arith.constant 3.200000e+01 : f32
    %13 = vector.broadcast %cst_3 : f32 to vector<16x1xf32>
    %14 = arith.divf %12, %13 : vector<16x1xf32>
    %15 = vector.broadcast %14 : vector<16x1xf32> to vector<16x32xf32>
    %16 = arith.subf %0, %15 : vector<16x32xf32>
    %17 = arith.mulf %16, %16 : vector<16x32xf32>
    %cst_4 = arith.constant dense<0.000000e+00> : vector<16xf32>
    %18 = vector.multi_reduction <add>, %17, %cst_4 [1] : vector<16x32xf32> to vector<16xf32>
    %19 = vector.shape_cast %18 : vector<16xf32> to vector<16x1xf32>
    %cst_5 = arith.constant 3.200000e+01 : f32
    %20 = vector.broadcast %cst_5 : f32 to vector<16x1xf32>
    %21 = arith.divf %19, %20 : vector<16x1xf32>
    %22 = vector.broadcast %14 : vector<16x1xf32> to vector<16x32xf32>
    %23 = arith.subf %0, %22 : vector<16x32xf32>
    %cst_6 = arith.constant 9.99999974E-6 : f32
    %24 = vector.broadcast %cst_6 : f32 to vector<16x1xf32>
    %25 = arith.addf %21, %24 : vector<16x1xf32>
    %26 = math.rsqrt %25 : vector<16x1xf32>
    %27 = vector.broadcast %26 : vector<16x1xf32> to vector<16x32xf32>
    %28 = arith.mulf %23, %27 : vector<16x32xf32>
    %29 = vector.broadcast %2 : vector<1x32xf32> to vector<16x32xf32>
    %30 = arith.mulf %28, %29 : vector<16x32xf32>
    %31 = vector.broadcast %3 : vector<1x32xf32> to vector<16x32xf32>
    %32 = arith.addf %30, %31 : vector<16x32xf32>
    %c0_7 = arith.constant 0 : index
    %c0_8 = arith.constant 0 : index
    %33 = vector.load %arg1[%c0_7, %c0_8] : memref<32x128xbf16, #tpu.memory_space<vmem>>, vector<32x96xbf16>
    %c0_9 = arith.constant 0 : index
    %c96 = arith.constant 96 : index
    %34 = vector.load %arg1[%c0_9, %c96] : memref<32x128xbf16, #tpu.memory_space<vmem>>, vector<32x32xbf16>
    %35 = arith.truncf %32 : vector<16x32xf32> to vector<16x32xbf16>
    %cst_10 = arith.constant dense<0.000000e+00> : vector<16x96xf32>
    %36 = tpu.matmul %35, %33, %cst_10 {dimension_numbers = #tpu.dot_dimension_numbers<[1], [0], [0], [1], [0, 0, 1, 1], [], []>} : vector<16x32xbf16>, vector<32x96xbf16>, vector<16x96xf32> -> vector<16x96xf32>
    %37 = vector.shape_cast %36 : vector<16x96xf32> to vector<2x8x96xf32>
    %38 = vector.extract_strided_slice %37 {offsets = [0, 0, 0], sizes = [2, 8, 8], strides = [1, 1, 1]} : vector<2x8x96xf32> to vector<2x8x8xf32>
    %39 = vector.extract_strided_slice %37 {offsets = [0, 0, 8], sizes = [2, 8, 8], strides = [1, 1, 1]} : vector<2x8x96xf32> to vector<2x8x8xf32>
    %40 = vector.extract_strided_slice %37 {offsets = [0, 0, 16], sizes = [2, 8, 8], strides = [1, 1, 1]} : vector<2x8x96xf32> to vector<2x8x8xf32>
    %41 = vector.extract_strided_slice %37 {offsets = [0, 0, 24], sizes = [2, 8, 8], strides = [1, 1, 1]} : vector<2x8x96xf32> to vector<2x8x8xf32>
    %42 = vector.shape_cast %38 : vector<2x8x8xf32> to vector<2x1x8x8xf32>
    %43 = vector.shape_cast %39 : vector<2x8x8xf32> to vector<2x1x8x8xf32>
    %44 = vector.shape_cast %40 : vector<2x8x8xf32> to vector<2x1x8x8xf32>
    %45 = vector.shape_cast %41 : vector<2x8x8xf32> to vector<2x1x8x8xf32>
    %46 = tpu.concatenate %42, %43, %44, %45 in 1 : vector<2x1x8x8xf32>, vector<2x1x8x8xf32>, vector<2x1x8x8xf32>, vector<2x1x8x8xf32> -> vector<2x4x8x8xf32>
    %47 = vector.shape_cast %46 : vector<2x4x8x8xf32> to vector<8x8x8xf32>
    %48 = arith.truncf %47 : vector<8x8x8xf32> to vector<8x8x8xbf16>
    %49 = vector.extract_strided_slice %37 {offsets = [0, 0, 32], sizes = [2, 8, 8], strides = [1, 1, 1]} : vector<2x8x96xf32> to vector<2x8x8xf32>
    %50 = vector.extract_strided_slice %37 {offsets = [0, 0, 40], sizes = [2, 8, 8], strides = [1, 1, 1]} : vector<2x8x96xf32> to vector<2x8x8xf32>
    %51 = vector.extract_strided_slice %37 {offsets = [0, 0, 48], sizes = [2, 8, 8], strides = [1, 1, 1]} : vector<2x8x96xf32> to vector<2x8x8xf32>
    %52 = vector.extract_strided_slice %37 {offsets = [0, 0, 56], sizes = [2, 8, 8], strides = [1, 1, 1]} : vector<2x8x96xf32> to vector<2x8x8xf32>
    %53 = vector.shape_cast %49 : vector<2x8x8xf32> to vector<2x1x8x8xf32>
    %54 = vector.shape_cast %50 : vector<2x8x8xf32> to vector<2x1x8x8xf32>
    %55 = vector.shape_cast %51 : vector<2x8x8xf32> to vector<2x1x8x8xf32>
    %56 = vector.shape_cast %52 : vector<2x8x8xf32> to vector<2x1x8x8xf32>
    %57 = tpu.concatenate %53, %54, %55, %56 in 1 : vector<2x1x8x8xf32>, vector<2x1x8x8xf32>, vector<2x1x8x8xf32>, vector<2x1x8x8xf32> -> vector<2x4x8x8xf32>
    %58 = vector.shape_cast %57 : vector<2x4x8x8xf32> to vector<8x8x8xf32>
    %59 = arith.truncf %58 : vector<8x8x8xf32> to vector<8x8x8xbf16>
    %60 = vector.extract_strided_slice %37 {offsets = [0, 0, 64], sizes = [2, 8, 8], strides = [1, 1, 1]} : vector<2x8x96xf32> to vector<2x8x8xf32>
    %61 = vector.extract_strided_slice %37 {offsets = [0, 0, 72], sizes = [2, 8, 8], strides = [1, 1, 1]} : vector<2x8x96xf32> to vector<2x8x8xf32>
    %62 = vector.extract_strided_slice %37 {offsets = [0, 0, 80], sizes = [2, 8, 8], strides = [1, 1, 1]} : vector<2x8x96xf32> to vector<2x8x8xf32>
    %63 = vector.extract_strided_slice %37 {offsets = [0, 0, 88], sizes = [2, 8, 8], strides = [1, 1, 1]} : vector<2x8x96xf32> to vector<2x8x8xf32>
    %64 = vector.shape_cast %60 : vector<2x8x8xf32> to vector<2x1x8x8xf32>
    %65 = vector.shape_cast %61 : vector<2x8x8xf32> to vector<2x1x8x8xf32>
    %66 = vector.shape_cast %62 : vector<2x8x8xf32> to vector<2x1x8x8xf32>
    %67 = vector.shape_cast %63 : vector<2x8x8xf32> to vector<2x1x8x8xf32>
    %68 = tpu.concatenate %64, %65, %66, %67 in 1 : vector<2x1x8x8xf32>, vector<2x1x8x8xf32>, vector<2x1x8x8xf32>, vector<2x1x8x8xf32> -> vector<2x4x8x8xf32>
    %69 = vector.shape_cast %68 : vector<2x4x8x8xf32> to vector<8x8x8xf32>
    %70 = arith.truncf %69 : vector<8x8x8xf32> to vector<8x8x8xbf16>
    "tpu.trace_start"() <{level = 10 : i32, message = "nqd,nkd->nqk"}> : () -> ()
    %cst_11 = arith.constant dense<0.000000e+00> : vector<8x8x8xf32>
    %71 = tpu.matmul %48, %59, %cst_11 {dimension_numbers = #tpu.dot_dimension_numbers<[2], [2], [1], [1], [0, 0, 0, 1, 1, 1], [0], [0]>} : vector<8x8x8xbf16>, vector<8x8x8xbf16>, vector<8x8x8xf32> -> vector<8x8x8xf32>
    "tpu.trace_stop"() : () -> ()
    %72 = vector.broadcast %10 : vector<1x8x8xf32> to vector<8x8x8xf32>
    %73 = arith.addf %71, %72 : vector<8x8x8xf32>
    %cst_12 = arith.constant dense<0xFF800000> : vector<8x8xf32>
    %74 = vector.multi_reduction <maximumf>, %73, %cst_12 [2] : vector<8x8x8xf32> to vector<8x8xf32>
    %75 = vector.shape_cast %74 : vector<8x8xf32> to vector<8x8x1xf32>
    %76 = vector.broadcast %75 : vector<8x8x1xf32> to vector<8x8x8xf32>
    %77 = arith.subf %73, %76 : vector<8x8x8xf32>
    %78 = math.exp %77 : vector<8x8x8xf32>
    %cst_13 = arith.constant dense<0.000000e+00> : vector<8x8xf32>
    %79 = vector.multi_reduction <add>, %78, %cst_13 [2] : vector<8x8x8xf32> to vector<8x8xf32>
    %80 = vector.shape_cast %79 : vector<8x8xf32> to vector<8x8x1xf32>
    %81 = tpu.reciprocal %80 {approx = true} : vector<8x8x1xf32> -> vector<8x8x1xf32>
    %82 = vector.broadcast %81 : vector<8x8x1xf32> to vector<8x8x8xf32>
    %83 = arith.mulf %78, %82 : vector<8x8x8xf32>
    %84 = arith.truncf %83 : vector<8x8x8xf32> to vector<8x8x8xbf16>
    "tpu.trace_start"() <{level = 10 : i32, message = "nqk,nkd->nqd"}> : () -> ()
    %cst_14 = arith.constant dense<0.000000e+00> : vector<8x8x8xf32>
    %85 = tpu.matmul %84, %70, %cst_14 {dimension_numbers = #tpu.dot_dimension_numbers<[2], [1], [1], [2], [0, 0, 0, 1, 1, 2], [0], [0]>} : vector<8x8x8xbf16>, vector<8x8x8xbf16>, vector<8x8x8xf32> -> vector<8x8x8xf32>
    "tpu.trace_stop"() : () -> ()
    %86 = vector.shape_cast %85 : vector<8x8x8xf32> to vector<2x4x8x8xf32>
    %87 = vector.extract_strided_slice %86 {offsets = [0, 0, 0, 0], sizes = [2, 1, 8, 8], strides = [1, 1, 1, 1]} : vector<2x4x8x8xf32> to vector<2x1x8x8xf32>
    %88 = vector.shape_cast %87 : vector<2x1x8x8xf32> to vector<2x8x8xf32>
    %89 = vector.extract_strided_slice %86 {offsets = [0, 1, 0, 0], sizes = [2, 1, 8, 8], strides = [1, 1, 1, 1]} : vector<2x4x8x8xf32> to vector<2x1x8x8xf32>
    %90 = vector.shape_cast %89 : vector<2x1x8x8xf32> to vector<2x8x8xf32>
    %91 = vector.extract_strided_slice %86 {offsets = [0, 2, 0, 0], sizes = [2, 1, 8, 8], strides = [1, 1, 1, 1]} : vector<2x4x8x8xf32> to vector<2x1x8x8xf32>
    %92 = vector.shape_cast %91 : vector<2x1x8x8xf32> to vector<2x8x8xf32>
    %93 = vector.extract_strided_slice %86 {offsets = [0, 3, 0, 0], sizes = [2, 1, 8, 8], strides = [1, 1, 1, 1]} : vector<2x4x8x8xf32> to vector<2x1x8x8xf32>
    %94 = vector.shape_cast %93 : vector<2x1x8x8xf32> to vector<2x8x8xf32>
    %95 = tpu.concatenate %88, %90, %92, %94 in 2 : vector<2x8x8xf32>, vector<2x8x8xf32>, vector<2x8x8xf32>, vector<2x8x8xf32> -> vector<2x8x32xf32>
    %96 = vector.shape_cast %95 : vector<2x8x32xf32> to vector<16x32xf32>
    %97 = arith.truncf %96 : vector<16x32xf32> to vector<16x32xbf16>
    %cst_15 = arith.constant dense<0.000000e+00> : vector<16x32xf32>
    %98 = tpu.matmul %97, %34, %cst_15 {dimension_numbers = #tpu.dot_dimension_numbers<[1], [0], [0], [1], [0, 0, 1, 1], [], []>} : vector<16x32xbf16>, vector<32x32xbf16>, vector<16x32xf32> -> vector<16x32xf32>
    %99 = arith.addf %0, %98 : vector<16x32xf32>
    %100 = vector.broadcast %6 : vector<1x32xf32> to vector<16x32xf32>
    %101 = arith.addf %99, %100 : vector<16x32xf32>
    %cst_16 = arith.constant dense<0.000000e+00> : vector<16xf32>
    %102 = vector.multi_reduction <add>, %101, %cst_16 [1] : vector<16x32xf32> to vector<16xf32>
    %103 = vector.shape_cast %102 : vector<16xf32> to vector<16x1xf32>
    %cst_17 = arith.constant 3.200000e+01 : f32
    %104 = vector.broadcast %cst_17 : f32 to vector<16x1xf32>
    %105 = arith.divf %103, %104 : vector<16x1xf32>
    %106 = vector.broadcast %105 : vector<16x1xf32> to vector<16x32xf32>
    %107 = arith.subf %101, %106 : vector<16x32xf32>
    %108 = arith.mulf %107, %107 : vector<16x32xf32>
    %cst_18 = arith.constant dense<0.000000e+00> : vector<16xf32>
    %109 = vector.multi_reduction <add>, %108, %cst_18 [1] : vector<16x32xf32> to vector<16xf32>
    %110 = vector.shape_cast %109 : vector<16xf32> to vector<16x1xf32>
    %cst_19 = arith.constant 3.200000e+01 : f32
    %111 = vector.broadcast %cst_19 : f32 to vector<16x1xf32>
    %112 = arith.divf %110, %111 : vector<16x1xf32>
    %113 = vector.broadcast %105 : vector<16x1xf32> to vector<16x32xf32>
    %114 = arith.subf %101, %113 : vector<16x32xf32>
    %cst_20 = arith.constant 9.99999974E-6 : f32
    %115 = vector.broadcast %cst_20 : f32 to vector<16x1xf32>
    %116 = arith.addf %112, %115 : vector<16x1xf32>
    %117 = math.rsqrt %116 : vector<16x1xf32>
    %118 = vector.broadcast %117 : vector<16x1xf32> to vector<16x32xf32>
    %119 = arith.mulf %114, %118 : vector<16x32xf32>
    %120 = vector.broadcast %4 : vector<1x32xf32> to vector<16x32xf32>
    %121 = arith.mulf %119, %120 : vector<16x32xf32>
    %122 = vector.broadcast %5 : vector<1x32xf32> to vector<16x32xf32>
    %123 = arith.addf %121, %122 : vector<16x32xf32>
    %124 = arith.truncf %123 : vector<16x32xf32> to vector<16x32xbf16>
    %c0_21 = arith.constant 0 : index
    %c0_22 = arith.constant 0 : index
    %125 = vector.load %arg2[%c0_21, %c0_22] : memref<32x128xbf16, #tpu.memory_space<vmem>>, vector<32x128xbf16>
    %cst_23 = arith.constant dense<0.000000e+00> : vector<16x128xf32>
    %126 = tpu.matmul %124, %125, %cst_23 {dimension_numbers = #tpu.dot_dimension_numbers<[1], [0], [0], [1], [0, 0, 1, 1], [], []>} : vector<16x32xbf16>, vector<32x128xbf16>, vector<16x128xf32> -> vector<16x128xf32>
    %127 = vector.broadcast %8 : vector<1x128xf32> to vector<16x128xf32>
    %128 = arith.addf %126, %127 : vector<16x128xf32>
    %cst_24 = arith.constant 0.000000e+00 : f32
    %129 = vector.broadcast %cst_24 : f32 to vector<16x128xf32>
    %130 = arith.maximumf %128, %129 : vector<16x128xf32>
    %131 = arith.truncf %130 : vector<16x128xf32> to vector<16x128xbf16>
    %c0_25 = arith.constant 0 : index
    %c0_26 = arith.constant 0 : index
    %132 = vector.load %arg3[%c0_25, %c0_26] : memref<128x32xbf16, #tpu.memory_space<vmem>>, vector<128x32xbf16>
    %cst_27 = arith.constant dense<0.000000e+00> : vector<16x32xf32>
    %133 = tpu.matmul %131, %132, %cst_27 {dimension_numbers = #tpu.dot_dimension_numbers<[1], [0], [0], [1], [0, 0, 1, 1], [], []>} : vector<16x128xbf16>, vector<128x32xbf16>, vector<16x32xf32> -> vector<16x32xf32>
    %134 = vector.broadcast %7 : vector<1x32xf32> to vector<16x32xf32>
    %135 = arith.addf %133, %134 : vector<16x32xf32>
    %136 = arith.addf %101, %135 : vector<16x32xf32>
    %c0_28 = arith.constant 0 : index
    %c0_29 = arith.constant 0 : index
    %137 = vector.load %arg5[%c0_28, %c0_29] : memref<16x32xf32, #tpu.memory_space<vmem>>, vector<16x32xf32>
    tpu.vector_store %arg5[%c0_28, %c0_29], %136 {strides = array<i32>} : memref<16x32xf32, #tpu.memory_space<vmem>>, vector<16x32xf32>,
    return
  }
}

</mosaic_0001>

<bundles_post_ra>
// kernel: tpu_custom_call.1
= control target key start
LH: loop header
LB: loop body
LE: loop exit
PB: predicated region body
PF: predicated region fallthrough
CT: control target
= control target key end

     0   :  { %vm26_vm0 = vcmask 261120   ;;  %s2065_s0 = inlined_call_operand.vmem [shape: f32[16,32], index: 0, kind: input, shape index: {}]   ;;  %s2066_s1 = inlined_call_operand.vmem [shape: bf16[32,128], index: 1, kind: input, shape index: {}]   ;;  %s2067_s2 = inlined_call_operand.vmem [shape: bf16[32,128], index: 2, kind: input, shape index: {}]   ;;  %s2068_s3 = inlined_call_operand.vmem [shape: bf16[128,32], index: 3, kind: input, shape index: {}]   ;;  %s2069_s4 = inlined_call_operand.vmem [shape: f32[16,128], index: 4, kind: input, shape index: {}]   ;;  %s2070_s5 = inlined_call_operand.hbm [shape: f32[16,32], index: 5, kind: output, shape index: {}]  }
   0x1   :  { %v1724_v0 = vld [vmem:[%s2065_s0] sm:$0xff]  ;;  %v1729_v1 = vld [vmem:[%s2065_s0 + $0x8] sm:$0xff] }
   0x2   :  { %v27_v2 = vsel %vm26_vm0, %v1724_v0, 0.0  ;;  %v30_v3 = vsel %vm26_vm0, %v1729_v1, 0.0 }
   0x3   :  { %28 = vadd.xlane.f32.xlu0 %v27_v2 }
   0x7   :  { %31 = vadd.xlane.f32.xlu0 %v30_v3 }
   0x8   :  { %10 = vsyncpa [#allocation3], 0  ;;  %v1742_v14 = vld [vmem:[%s2066_s1 + $0x8] sm:$0xff]   ;;  %v1678_v15 = vmov 0.0   ;;  %vm1679_vm1 = vmmov 0   ;;  %v1751_v16 = vld [vmem:[%s2066_s1] sm:$0xff]   ;;  %v54_v23 = vlaneseq }
   0x9   :  { %1436 = vmatprep.subr.bf16.mxu0 %v1678_v15  ;;  %1440 = vmatprep.mubr.msk.bf16.mxu0 %vm1679_vm1, %v1678_v15  ;;  %v1765_v26 = vld [vmem:[%s2069_s4] sm:$0xff]  ;;  %s1680_s26 = smov 112   ;;  %s1681_s27 = smov 120   ;;  %vm158_vm2 = vcmask 64512   ;;  %vm649_vm3 = vcmask 1043456   ;;  %vm1055_vm4 = vcmask 130048  }
   0xa   :  { %1437 = vmatpush3.bf16.msra.mxu0 %v1742_v14  ;;  %1456 = vmatprep.subr.bf16.mxu1 %v1678_v15  ;;  %v1759_v24 = vshrl.u32 %v54_v23, 7  ;;  %s1682_s28 = smov 104   ;;  %s1683_s29 = smov 96   ;;  %vm1058_vm5 = vcmask 195584  }
   0xb   :  { %1438 = vmatprep.subr.bf16.mxu0 %v1678_v15  ;;  %1458 = vmatprep.mubr.msk.bf16.mxu1 %vm1679_vm1, %v1678_v15  ;;  %s1685_s7 = smov 32   ;;  %s1686_s8 = smov 16  }
   0xc   :  { %v56_v25 = vsub.s32 0, %v1759_v24  ;;  %v62_v30 = vsub.s32 1, %v1759_v24  ;;  %s1687_s9 = smov 8   ;;  %s1688_s10 = smov 24  }
   0xe   :  { %1439 = vmatpush3.bf16.msra.mxu0 %v1751_v16  ;;  %v57_v29 = vrot.slane %v1765_v26, %v56_v25  ;;  %v63_v34 = vrot.slane %v1765_v26, %v62_v30 }
   0xf   :  { %1444 = vmatprep.subr.bf16.mxu0 %v1678_v15 }
  0x8c   :  { %v29_v4 = vpop.xlane.xlu0 %28 }
  0x8d   :  { %v34_v5 = vmul.f32 0.03125, %v29_v4 }
  0x8f   :  { %v36_v6 = vsub.f32 %v1724_v0, %v34_v5 }
  0x90   :  { %v32_v7 = vpop.xlane.xlu0 %31 }
  0x91   :  { %v35_v8 = vmul.f32 0.03125, %v32_v7  ;;  %v38_v9 = vmul.f32 %v36_v6, %v36_v6 }
  0x93   :  { %v37_v10 = vsub.f32 %v1729_v1, %v35_v8  ;;  %v40_v11 = vsel %vm26_vm0, %v38_v9, 0.0 }
  0x94   :  { %41 = vadd.xlane.f32.xlu1 %v40_v11  ;;  %v1848_v11 = vld [vmem:[%s2069_s4 + $0x8] sm:$0xff]  ;;  %s1684_s4 = smov 64  }
  0x95   :  { %v39_v12 = vmul.f32 %v37_v10, %v37_v10 }
  0x97   :  { %v43_v13 = vsel %vm26_vm0, %v39_v12, 0.0 }
  0x98   :  { %44 = vadd.xlane.f32.xlu1 %v43_v13 }
 0x11d   :  { %v42_v17 = vpop.xlane.xlu1 %41 }
 0x11e   :  { %v46_v18 = vmul.f32 0.03125, %v42_v17 }
 0x120   :  { %v48_v19 = vadd.f32 1e-05, %v46_v18 }
 0x121   :  { %v45_v20 = vpop.xlane.xlu1 %44 }
 0x122   :  { %1616 = vrsqrt.f32 %v48_v19  ;;  %v47_v21 = vmul.f32 0.03125, %v45_v20 }
 0x124   :  { %v49_v22 = vadd.f32 1e-05, %v47_v21 }
 0x126   :  { %1618 = vrsqrt.f32 %v49_v22 }
 0x12f   :  { %v1617_v27 = vpop.eup %1616 }
 0x130   :  { %v52_v28 = vmul.f32 %v1617_v27, %v36_v6 }
 0x132   :  { %v58_v33 = vmul.f32 %v57_v29, %v52_v28 }
 0x133   :  { %v1619_v31 = vpop.eup %1618 }
 0x134   :  { %v53_v32 = vmul.f32 %v1619_v31, %v37_v10  ;;  %v64_v36 = vadd.f32 %v63_v34, %v58_v33 }
 0x136   :  { %v59_v35 = vmul.f32 %v57_v29, %v53_v32 }
 0x138   :  { %v65_v37 = vadd.f32 %v63_v34, %v59_v35 }
 0x13a   :  { %v70_v38 = vpack.c.bf16 %v65_v37, %v64_v36 }
 0x13c   :  { %1441 = vmatmul.mubr.msk.bf16.vlgmr.msra.gmra.mxu0 %vm26_vm0, %v70_v38 }
 0x13d   :  { %1446 = vmatprep.mubr.msk.bf16.mxu0 %vm1679_vm1, %v1678_v15 }
 0x1fc   :  { %v120_v39 = vpop.f32.mrf.mxu0 }
 0x1fd   :  { %135 = vrot.lane.b32.xlu1 %v120_v39, %s1680_s26  ;;  %129 = vrot.lane.b32.xlu0 %v120_v39, %s1681_s27  ;;  %v1773_v43 = vpack.c.bf16 %v120_v39, %v120_v39 }
 0x1fe   :  { %v1442_v40 = vpop.f32.mrf.mxu0 }
 0x200   :  { %v123_v41 = vpop.f32.mrf.mxu0 }
 0x201   :  { %141 = vrot.lane.b32.xlu1 %v120_v39, %s1682_s28  ;;  %137 = vrot.lane.b32.xlu0 %v123_v41, %s1680_s26  ;;  %v1784_v51 = vpack.c.bf16 %v123_v41, %v123_v41 }
 0x202   :  { %v1443_v42 = vpop.f32.mrf.mxu0 }
 0x205   :  { %156 = vrot.lane.b32.xlu0 %v1773_v43, %s1683_s29  ;;  %131 = vrot.lane.b32.xlu1 %v123_v41, %s1681_s27 }
 0x209   :  { %143 = vrot.lane.b32.xlu1 %v123_v41, %s1682_s28 }
 0x26f   :  { %v136_v44 = vpop.permute.xlu1 %135  ;;  %v130_v45 = vpop.permute.xlu0 %129 }
 0x270   :  { %v1776_v46 = vpack.c.bf16 %v136_v44, %v136_v44  ;;  %v1778_v47 = vpack.c.bf16 %v130_v45, %v130_v45 }
 0x272   :  { %255 = vrot.lane.b32.xlu0 %v1776_v46, %s1683_s29  ;;  %206 = vrot.lane.b32.xlu1 %v1778_v47, %s1683_s29 }
 0x273   :  { %v142_v48 = vpop.permute.xlu1 %141  ;;  %v138_v49 = vpop.permute.xlu0 %137 }
 0x274   :  { %v1782_v50 = vpack.c.bf16 %v142_v48, %v142_v48  ;;  %v1788_v54 = vpack.c.bf16 %v138_v49, %v138_v49 }
 0x276   :  { %304 = vrot.lane.b32.xlu1 %v1782_v50, %s1683_s29  ;;  %353 = vrot.lane.b32.xlu0 %v1784_v51, %s1683_s29 }
 0x277   :  { %v157_v52 = vpop.permute.xlu0 %156  ;;  %v132_v53 = vpop.permute.xlu1 %131 }
 0x278   :  { %v163_v55 = vsel %vm158_vm2, %v157_v52, 0  ;;  %v1791_v56 = vpack.c.bf16 %v132_v53, %v132_v53 }
 0x279   :  { %1445 = vmatpush3.bf16.xpose.msra.mxu0 %v163_v55 }
 0x27a   :  { %402 = vrot.lane.b32.xlu1 %v1791_v56, %s1683_s29  ;;  %451 = vrot.lane.b32.xlu0 %v1788_v54, %s1683_s29 }
 0x27b   :  { %v144_v57 = vpop.permute.xlu1 %143  ;;  %1450 = vmatprep.subr.bf16.mxu0 %v1678_v15 }
 0x27c   :  { %v1796_v58 = vpack.c.bf16 %v144_v57, %v144_v57 }
 0x27e   :  { %500 = vrot.lane.b32.xlu1 %v1796_v58, %s1683_s29 }
 0x280   :  { %1447 = vmatmul.mubr.msk.bf16.vlgmr.msra.gmra.mxu0 %vm158_vm2, %v1773_v43 }
 0x281   :  { %1452 = vmatprep.mubr.msk.bf16.mxu0 %vm1679_vm1, %v1678_v15 }
 0x2e4   :  { %v256_v59 = vpop.permute.xlu0 %255  ;;  %v207_v60 = vpop.permute.xlu1 %206 }
 0x2e5   :  { %v212_v61 = vsel %vm158_vm2, %v207_v60, 0  ;;  %v261_v62 = vsel %vm158_vm2, %v256_v59, 0 }
 0x2e6   :  { %1451 = vmatpush3.bf16.xpose.msra.mxu0 %v212_v61  ;;  %1457 = vmatpush3.bf16.xpose.msra.mxu1 %v261_v62 }
 0x2e7   :  { %1462 = vmatprep.subr.bf16.mxu0 %v1678_v15  ;;  %1468 = vmatprep.subr.bf16.mxu1 %v1678_v15 }
 0x2e8   :  { %v305_v63 = vpop.permute.xlu1 %304  ;;  %v354_v2 = vpop.permute.xlu0 %353 }
 0x2e9   :  { %v310_v3 = vsel %vm158_vm2, %v305_v63, 0  ;;  %v359_v4 = vsel %vm158_vm2, %v354_v2, 0 }
 0x2ec   :  { %v403_v5 = vpop.permute.xlu1 %402  ;;  %v452_v6 = vpop.permute.xlu0 %451 }
 0x2ed   :  { %1453 = vmatmul.mubr.msk.bf16.vlgmr.msra.gmra.mxu0 %vm158_vm2, %v1778_v47  ;;  %1459 = vmatmul.mubr.msk.bf16.vlgmr.msra.gmra.mxu1 %vm158_vm2, %v1776_v46  ;;  %v408_v7 = vsel %vm158_vm2, %v403_v5, 0  ;;  %v457_v8 = vsel %vm158_vm2, %v452_v6, 0 }
 0x2ee   :  { %1463 = vmatpush3.bf16.xpose.msra.mxu0 %v310_v3  ;;  %1469 = vmatpush3.bf16.xpose.msra.mxu1 %v359_v4 }
 0x2ef   :  { %1464 = vmatprep.mubr.msk.bf16.mxu0 %vm1679_vm1, %v1678_v15  ;;  %1470 = vmatprep.mubr.msk.bf16.mxu1 %vm1679_vm1, %v1678_v15 }
 0x2f0   :  { %1474 = vmatprep.subr.bf16.mxu0 %v1678_v15  ;;  %1480 = vmatprep.subr.bf16.mxu1 %v1678_v15  ;;  %v501_v9 = vpop.permute.xlu1 %500 }
 0x2f1   :  { %v506_v10 = vsel %vm158_vm2, %v501_v9, 0 }
 0x2f5   :  { %1465 = vmatmul.mubr.msk.bf16.vlgmr.msra.gmra.mxu0 %vm158_vm2, %v1782_v50  ;;  %1471 = vmatmul.mubr.msk.bf16.vlgmr.msra.gmra.mxu1 %vm158_vm2, %v1784_v51 }
 0x2f6   :  { %1475 = vmatpush3.bf16.xpose.msra.mxu0 %v408_v7  ;;  %1481 = vmatpush3.bf16.xpose.msra.mxu1 %v457_v8 }
 0x2f7   :  { %1476 = vmatprep.mubr.msk.bf16.mxu0 %vm1679_vm1, %v1678_v15  ;;  %1482 = vmatprep.mubr.msk.bf16.mxu1 %vm1679_vm1, %v1678_v15 }
 0x2f8   :  { %1486 = vmatprep.subr.bf16.mxu0 %v1678_v15  ;;  %1492 = vmatprep.subr.bf16.mxu1 %v1678_v15 }
 0x2fd   :  { %1477 = vmatmul.mubr.msk.bf16.vlgmr.msra.gmra.mxu0 %vm158_vm2, %v1791_v56  ;;  %1483 = vmatmul.mubr.msk.bf16.vlgmr.msra.gmra.mxu1 %vm158_vm2, %v1788_v54 }
 0x2fe   :  { %1487 = vmatpush3.bf16.xpose.msra.mxu0 %v506_v10  ;;  %1488 = vmatprep.mubr.msk.bf16.mxu0 %vm1679_vm1, %v1678_v15 }
 0x2ff   :  { %1498 = vmatprep.subr.bf16.mxu0 %v1678_v15  ;;  %1494 = vmatprep.mubr.msk.bf16.mxu1 %vm1679_vm1, %v1678_v15 }
 0x305   :  { %1489 = vmatmul.mubr.msk.bf16.vlgmr.msra.gmra.mxu0 %vm158_vm2, %v1796_v58 }
 0x306   :  { %1500 = vmatprep.mubr.msk.bf16.mxu0 %vm1679_vm1, %v1678_v15 }
 0x340   :  { %v199_v12 = vpop.f32.mrf.mxu0 }
 0x341   :  { %v200_v13 = vadd.f32 %v199_v12, %v1848_v11 }
 0x342   :  { %v1448_v17 = vpop.f32.mrf.mxu0 }
 0x343   :  { %v548_v18 = vsel %vm158_vm2, %v200_v13, -inf }
 0x344   :  { %549 = vmax.xlane.f32.xlu0 %v548_v18  ;;  %v202_v19 = vpop.f32.mrf.mxu0 }
 0x346   :  { %v1449_v20 = vpop.f32.mrf.mxu0 }
 0x3ad   :  { %v248_v21 = vpop.f32.mrf.mxu0  ;;  %v297_v22 = vpop.f32.mrf.mxu1 }
 0x3ae   :  { %v1853_v23 = vadd.f32 %v248_v21, %v1848_v11  ;;  %v298_v25 = vadd.f32 %v297_v22, %v1848_v11 }
 0x3af   :  { %v1454_v27 = vpop.f32.mrf.mxu0  ;;  %v1460_v28 = vpop.f32.mrf.mxu1 }
 0x3b0   :  { %v554_v29 = vsel %vm158_vm2, %v298_v25, -inf  ;;  %v551_v30 = vsel %vm158_vm2, %v1853_v23, -inf }
 0x3b1   :  { %v300_v31 = vpop.f32.mrf.mxu1  ;;  %555 = vmax.xlane.f32.xlu0 %v554_v29  ;;  %552 = vmax.xlane.f32.xlu1 %v551_v30  ;;  %v251_v32 = vpop.f32.mrf.mxu0 }
 0x3b3   :  { %v1455_v33 = vpop.f32.mrf.mxu0  ;;  %v1461_v34 = vpop.f32.mrf.mxu1 }
 0x3b5   :  { %v346_v35 = vpop.f32.mrf.mxu0  ;;  %v395_v36 = vpop.f32.mrf.mxu1 }
 0x3b6   :  { %v1860_v37 = vadd.f32 %v346_v35, %v1848_v11  ;;  %v1863_v40 = vadd.f32 %v395_v36, %v1848_v11 }
 0x3b7   :  { %v1466_v38 = vpop.f32.mrf.mxu0  ;;  %v1472_v39 = vpop.f32.mrf.mxu1 }
 0x3b8   :  { %v557_v41 = vsel %vm158_vm2, %v1860_v37, -inf  ;;  %v560_v49 = vsel %vm158_vm2, %v1863_v40, -inf }
 0x3b9   :  { %v398_v42 = vpop.f32.mrf.mxu1  ;;  %558 = vmax.xlane.f32.xlu0 %v557_v41  ;;  %v349_v44 = vpop.f32.mrf.mxu0 }
 0x3bb   :  { %v1467_v45 = vpop.f32.mrf.mxu0  ;;  %v1473_v48 = vpop.f32.mrf.mxu1 }
 0x3bd   :  { %v493_v52 = vpop.f32.mrf.mxu1  ;;  %561 = vmax.xlane.f32.xlu0 %v560_v49  ;;  %v444_v53 = vpop.f32.mrf.mxu0 }
 0x3be   :  { %v1870_v55 = vadd.f32 %v493_v52, %v1848_v11  ;;  %v1873_v57 = vadd.f32 %v444_v53, %v1848_v11 }
 0x3bf   :  { %v1478_v59 = vpop.f32.mrf.mxu0  ;;  %v1484_v60 = vpop.f32.mrf.mxu1 }
 0x3c0   :  { %v566_v61 = vsel %vm158_vm2, %v1870_v55, -inf  ;;  %v563_v62 = vsel %vm158_vm2, %v1873_v57, -inf }
 0x3c1   :  { %v496_v63 = vpop.f32.mrf.mxu1  ;;  %567 = vmax.xlane.f32.xlu0 %v566_v61  ;;  %564 = vmax.xlane.f32.xlu1 %v563_v62  ;;  %v447_v2 = vpop.f32.mrf.mxu0 }
 0x3c3   :  { %v1479_v3 = vpop.f32.mrf.mxu0  ;;  %v1485_v4 = vpop.f32.mrf.mxu1 }
 0x3c5   :  { %v542_v5 = vpop.f32.mrf.mxu0 }
 0x3c6   :  { %v543_v18 = vadd.f32 %v542_v5, %v1848_v11 }
 0x3c7   :  { %v1490_v6 = vpop.f32.mrf.mxu0 }
 0x3c9   :  { %v545_v7 = vpop.f32.mrf.mxu0 }
 0x3cb   :  { %v1491_v8 = vpop.f32.mrf.mxu0 }
 0x3cd   :  { %v550_v9 = vpop.xlane.xlu0 %549 }
 0x3ce   :  { %v572_v10 = vsub.f32 %v200_v13, %v550_v9 }
 0x3d0   :  { %v580_v12 = vmul.f32 1.442695, %v572_v10 }
 0x3d2   :  { %693 = vrot.lane.b32.xlu1 %v1778_v47, %s1684_s4  ;;  %1620 = vpow2.f32 %v580_v12  ;;  %v569_v47 = vsel %vm158_vm2, %v543_v18, -inf }
 0x3d6   :  { %741 = vrot.lane.b32.xlu1 %v1776_v46, %s1684_s4 }
 0x3d7   :  { %644 = vrot.lane.b32.xlu0 %v1773_v43, %s1684_s4 }
 0x3df   :  { %v1885_v17 = vpop.eup %1620 }
 0x3e0   :  { %v596_v19 = vsel %vm158_vm2, %v1885_v17, 0.0 }
 0x3f6   :  { %597 = vadd.xlane.f32.xlu0 %v596_v19 }
 0x3fa   :  { %570 = vmax.xlane.f32.xlu1 %v569_v47 }
 0x40b   :  { %789 = vrot.lane.b32.xlu1 %v1782_v50, %s1684_s4 }
 0x43a   :  { %v556_v46 = vpop.xlane.xlu0 %555  ;;  %v553_v43 = vpop.xlane.xlu1 %552 }
 0x43b   :  { %v574_v20 = vsub.f32 %v298_v25, %v556_v46  ;;  %v573_v13 = vsub.f32 %v1853_v23, %v553_v43 }
 0x43d   :  { %v584_v21 = vmul.f32 1.442695, %v574_v20  ;;  %v582_v22 = vmul.f32 1.442695, %v573_v13 }
 0x43f   :  { %1622 = vpow2.f32 %v584_v21 }
 0x440   :  { %1624 = vpow2.f32 %v582_v22 }
 0x442   :  { %v559_v11 = vpop.xlane.xlu0 %558 }
 0x443   :  { %v575_v36 = vsub.f32 %v1860_v37, %v559_v11 }
 0x445   :  { %v586_v41 = vmul.f32 1.442695, %v575_v36 }
 0x446   :  { %v562_v27 = vpop.xlane.xlu0 %561 }
 0x447   :  { %v576_v35 = vsub.f32 %v1863_v40, %v562_v27 }
 0x449   :  { %v588_v38 = vmul.f32 1.442695, %v576_v35 }
 0x44a   :  { %v568_v28 = vpop.xlane.xlu0 %567  ;;  %v565_v29 = vpop.xlane.xlu1 %564 }
 0x44b   :  { %v578_v39 = vsub.f32 %v1870_v55, %v568_v28  ;;  %v577_v42 = vsub.f32 %v1873_v57, %v565_v29  ;;  %1626 = vpow2.f32 %v588_v38 }
 0x44c   :  { %v1894_v30 = vpop.eup %1622  ;;  %1628 = vpow2.f32 %v586_v41 }
 0x44d   :  { %v1896_v31 = vpop.eup %1624  ;;  %v602_v50 = vsel %vm158_vm2, %v1894_v30, 0.0  ;;  %v592_v44 = vmul.f32 1.442695, %v578_v39  ;;  %v590_v45 = vmul.f32 1.442695, %v577_v42 }
 0x44e   :  { %603 = vadd.xlane.f32.xlu0 %v602_v50  ;;  %v645_v25 = vpop.permute.xlu0 %644  ;;  %v694_v32 = vpop.permute.xlu1 %693  ;;  %v599_v23 = vsel %vm158_vm2, %v1896_v31, 0.0 }
 0x44f   :  { %v651_v33 = vsel %vm649_vm3, %v645_v25, 0  ;;  %v699_v34 = vsel %vm649_vm3, %v694_v32, 0  ;;  %600 = vadd.xlane.f32.xlu1 %v599_v23  ;;  %1630 = vpow2.f32 %v592_v44 }
 0x450   :  { %1493 = vmatpush3.bf16.msra.mxu1 %v651_v33  ;;  %1499 = vmatpush3.bf16.msra.mxu0 %v699_v34  ;;  %1632 = vpow2.f32 %v590_v45 }
 0x451   :  { %1504 = vmatprep.subr.bf16.mxu1 %v1678_v15  ;;  %1510 = vmatprep.subr.bf16.mxu0 %v1678_v15 }
 0x452   :  { %v742_v48 = vpop.permute.xlu1 %741 }
 0x453   :  { %v747_v3 = vsel %vm649_vm3, %v742_v48, 0 }
 0x460   :  { %885 = vrot.lane.b32.xlu1 %v1791_v56, %s1684_s4  ;;  %v1914_v56 = vpop.eup %1626 }
 0x461   :  { %v1916_v49 = vpop.eup %1628  ;;  %v608_v37 = vsel %vm158_vm2, %v1914_v56, 0.0 }
 0x462   :  { %v1920_v40 = vpop.eup %1630  ;;  %v605_v52 = vsel %vm158_vm2, %v1916_v49, 0.0 }
 0x463   :  { %v1924_v55 = vpop.eup %1632  ;;  %v614_v60 = vsel %vm158_vm2, %v1920_v40, 0.0 }
 0x464   :  { %837 = vrot.lane.b32.xlu0 %v1784_v51, %s1684_s4  ;;  %v611_v61 = vsel %vm158_vm2, %v1924_v55, 0.0 }
 0x47f   :  { %v598_v51 = vpop.xlane.xlu0 %597 }
 0x480   :  { %1634 = vrcp.f32 %v598_v51 }
 0x483   :  { %609 = vadd.xlane.f32.xlu0 %v608_v37  ;;  %v571_v53 = vpop.xlane.xlu1 %570 }
 0x484   :  { %606 = vadd.xlane.f32.xlu1 %v605_v52  ;;  %v579_v57 = vsub.f32 %v543_v18, %v571_v53 }
 0x486   :  { %v594_v59 = vmul.f32 1.442695, %v579_v57 }
 0x487   :  { %615 = vadd.xlane.f32.xlu0 %v614_v60  ;;  %v790_v6 = vpop.permute.xlu1 %789 }
 0x488   :  { %1636 = vpow2.f32 %v594_v59  ;;  %612 = vadd.xlane.f32.xlu1 %v611_v61 }
 0x48d   :  { %v1635_v62 = vpop.eup %1634 }
 0x48e   :  { %v628_v63 = vmul.f32 %v1635_v62, %v1885_v17 }
 0x490   :  { %v636_v2 = vpack.c.bf16 %v628_v63, %v628_v63 }
 0x492   :  { %1495 = vmatmul.mubr.msk.bf16.vlgmr.msra.gmra.mxu1 %vm158_vm2, %v636_v2 }
 0x493   :  { %1505 = vmatpush3.bf16.msra.mxu1 %v747_v3  ;;  %1506 = vmatprep.mubr.msk.bf16.mxu1 %vm1679_vm1, %v1678_v15 }
 0x494   :  { %1516 = vmatprep.subr.bf16.mxu1 %v1678_v15 }
 0x495   :  { %v1936_v4 = vpop.eup %1636 }
 0x496   :  { %v617_v5 = vsel %vm158_vm2, %v1936_v4, 0.0 }
 0x497   :  { %618 = vadd.xlane.f32.xlu1 %v617_v5 }
 0x49d   :  { %933 = vrot.lane.b32.xlu0 %v1788_v54, %s1684_s4  ;;  %v795_v54 = vsel %vm649_vm3, %v790_v6, 0 }
 0x4a1   :  { %1064 = vrot.lane.b32.xlu0 %v1742_v14, %s1685_s7 }
 0x4a8   :  { %981 = vrot.lane.b32.xlu1 %v1796_v58, %s1684_s4 }
 0x4d7   :  { %v604_v7 = vpop.xlane.xlu0 %603 }
 0x4d8   :  { %1638 = vrcp.f32 %v604_v7  ;;  %v601_v8 = vpop.xlane.xlu1 %600 }
 0x4d9   :  { %1640 = vrcp.f32 %v601_v8 }
 0x4db   :  { %v838_v17 = vpop.permute.xlu0 %837 }
 0x4dc   :  { %v843_v46 = vsel %vm649_vm3, %v838_v17, 0  ;;  %v886_v58 = vpop.permute.xlu1 %885 }
 0x4dd   :  { %v891_v23 = vsel %vm649_vm3, %v886_v58, 0 }
 0x4e5   :  { %v1639_v9 = vpop.eup %1638 }
 0x4e6   :  { %v1641_v10 = vpop.eup %1640  ;;  %v630_v12 = vmul.f32 %v1639_v9, %v1894_v30 }
 0x4e7   :  { %v629_v18 = vmul.f32 %v1641_v10, %v1896_v31 }
 0x4e8   :  { %v638_v19 = vpack.c.bf16 %v630_v12, %v630_v12 }
 0x4e9   :  { %v637_v47 = vpack.c.bf16 %v629_v18, %v629_v18 }
 0x4ea   :  { %1507 = vmatmul.mubr.msk.bf16.vlgmr.msra.gmra.mxu1 %vm158_vm2, %v638_v19 }
 0x4eb   :  { %1501 = vmatmul.mubr.msk.bf16.vlgmr.msra.gmra.mxu0 %vm158_vm2, %v637_v47  ;;  %1517 = vmatpush3.bf16.msra.mxu1 %v843_v46 }
 0x4ec   :  { %1511 = vmatpush3.bf16.msra.mxu0 %v795_v54  ;;  %1512 = vmatprep.mubr.msk.bf16.mxu0 %vm1679_vm1, %v1678_v15 }
 0x4ed   :  { %1518 = vmatprep.mubr.msk.bf16.mxu1 %vm1679_vm1, %v1678_v15  ;;  %1522 = vmatprep.subr.bf16.mxu0 %v1678_v15 }
 0x4ee   :  { %1528 = vmatprep.subr.bf16.mxu1 %v1678_v15 }
 0x50c   :  { %v610_v43 = vpop.xlane.xlu0 %609 }
 0x50d   :  { %1642 = vrcp.f32 %v610_v43  ;;  %v607_v20 = vpop.xlane.xlu1 %606 }
 0x50e   :  { %1644 = vrcp.f32 %v607_v20 }
 0x510   :  { %v616_v13 = vpop.xlane.xlu0 %615 }
 0x511   :  { %1646 = vrcp.f32 %v616_v13  ;;  %v613_v21 = vpop.xlane.xlu1 %612 }
 0x512   :  { %1648 = vrcp.f32 %v613_v21 }
 0x514   :  { %v934_v28 = vpop.permute.xlu0 %933 }
 0x515   :  { %v939_v32 = vsel %vm649_vm3, %v934_v28, 0 }
 0x518   :  { %v1065_v61 = vpop.permute.xlu0 %1064 }
 0x51a   :  { %v1643_v22 = vpop.eup %1642 }
 0x51b   :  { %v1645_v11 = vpop.eup %1644  ;;  %v632_v27 = vmul.f32 %v1643_v22, %v1914_v56 }
 0x51c   :  { %v631_v29 = vmul.f32 %v1645_v11, %v1916_v49 }
 0x51d   :  { %v640_v30 = vpack.c.bf16 %v632_v27, %v632_v27 }
 0x51e   :  { %v1647_v31 = vpop.eup %1646  ;;  %v639_v50 = vpack.c.bf16 %v631_v29, %v631_v29 }
 0x51f   :  { %v1649_v25 = vpop.eup %1648  ;;  %1519 = vmatmul.mubr.msk.bf16.vlgmr.msra.gmra.mxu1 %vm158_vm2, %v640_v30  ;;  %v634_v34 = vmul.f32 %v1647_v31, %v1920_v40 }
 0x520   :  { %1513 = vmatmul.mubr.msk.bf16.vlgmr.msra.gmra.mxu0 %vm158_vm2, %v639_v50  ;;  %1529 = vmatpush3.bf16.msra.mxu1 %v939_v32  ;;  %v619_v33 = vpop.xlane.xlu1 %618  ;;  %v633_v35 = vmul.f32 %v1649_v25, %v1924_v55 }
 0x521   :  { %1523 = vmatpush3.bf16.msra.mxu0 %v891_v23  ;;  %1650 = vrcp.f32 %v619_v33  ;;  %1524 = vmatprep.mubr.msk.bf16.mxu0 %vm1679_vm1, %v1678_v15  ;;  %v642_v38 = vpack.c.bf16 %v634_v34, %v634_v34 }
 0x522   :  { %1530 = vmatprep.mubr.msk.bf16.mxu1 %vm1679_vm1, %v1678_v15  ;;  %1534 = vmatprep.subr.bf16.mxu0 %v1678_v15  ;;  %v641_v41 = vpack.c.bf16 %v633_v35, %v633_v35 }
 0x523   :  { %1540 = vmatprep.subr.bf16.mxu1 %v1678_v15 }
 0x524   :  { %v982_v36 = vpop.permute.xlu1 %981 }
 0x525   :  { %v987_v39 = vsel %vm649_vm3, %v982_v36, 0 }
 0x527   :  { %1531 = vmatmul.mubr.msk.bf16.vlgmr.msra.gmra.mxu1 %vm158_vm2, %v642_v38  ;;  %v1116_v38 = vsub.s32 4, %v1759_v24 }
 0x528   :  { %1525 = vmatmul.mubr.msk.bf16.vlgmr.msra.gmra.mxu0 %vm158_vm2, %v641_v41  ;;  %1544 = vmatprep.mubr.msk.bf16.mxu1 %vm1679_vm1, %v1678_v15 }
 0x529   :  { %1535 = vmatpush3.bf16.msra.mxu0 %v987_v39  ;;  %1536 = vmatprep.mubr.msk.bf16.mxu0 %vm1679_vm1, %v1678_v15  ;;  %v1117_v39 = vrot.slane %v1765_v26, %v1116_v38 }
 0x52a   :  { %1548 = vmatprep.subr.bf16.mxu0 %v1678_v15  ;;  %1541 = vmatpush3.bf16.msra.mxu1 %v1065_v61 }
 0x52b   :  { %1542 = vmatprep.subr.bf16.mxu1 %v1678_v15 }
 0x52e   :  { %v1651_v42 = vpop.eup %1650 }
 0x52f   :  { %v635_v44 = vmul.f32 %v1651_v42, %v1936_v4 }
 0x531   :  { %v643_v45 = vpack.c.bf16 %v635_v44, %v635_v44 }
 0x533   :  { %1537 = vmatmul.mubr.msk.bf16.vlgmr.msra.gmra.mxu0 %vm158_vm2, %v643_v45 }
 0x534   :  { %1552 = vmatprep.mubr.msk.bf16.mxu0 %vm1679_vm1, %v1678_v15 }
 0x552   :  { %v687_v56 = vpop.f32.mrf.mxu1 }
 0x554   :  { %v1496_v48 = vpop.f32.mrf.mxu1 }
 0x556   :  { %v690_v51 = vpop.f32.mrf.mxu1 }
 0x558   :  { %v1497_v49 = vpop.f32.mrf.mxu1 }
 0x5aa   :  { %v783_v37 = vpop.f32.mrf.mxu1 }
 0x5ab   :  { %v735_v40 = vpop.f32.mrf.mxu0 }
 0x5ac   :  { %v1508_v52 = vpop.f32.mrf.mxu1 }
 0x5ad   :  { %v1502_v53 = vpop.f32.mrf.mxu0 }
 0x5ae   :  { %v786_v55 = vpop.f32.mrf.mxu1 }
 0x5af   :  { %v738_v57 = vpop.f32.mrf.mxu0 }
 0x5b0   :  { %v1509_v59 = vpop.f32.mrf.mxu1 }
 0x5b1   :  { %v1503_v60 = vpop.f32.mrf.mxu0 }
 0x5df   :  { %v879_v62 = vpop.f32.mrf.mxu1 }
 0x5e0   :  { %v831_v63 = vpop.f32.mrf.mxu0 }
 0x5e1   :  { %v1520_v2 = vpop.f32.mrf.mxu1 }
 0x5e2   :  { %v1514_v3 = vpop.f32.mrf.mxu0  ;;  %v1607_v2 = vld [vmem:[%s2067_s2] sm:$0xff]  }
 0x5e3   :  { %v882_v4 = vpop.f32.mrf.mxu1  ;;  %v1608_v3 = vld [vmem:[%s2068_s3 + $0x38] sm:$0xff]  }
 0x5e4   :  { %v834_v5 = vpop.f32.mrf.mxu0  ;;  %v1609_v4 = vld [vmem:[%s2068_s3 + $0x30] sm:$0xff]  }
 0x5e5   :  { %v1521_v6 = vpop.f32.mrf.mxu1  ;;  %v1610_v5 = vld [vmem:[%s2068_s3 + $0x28] sm:$0xff]  }
 0x5e6   :  { %v1515_v14 = vpop.f32.mrf.mxu0  ;;  %v1611_v6 = vld [vmem:[%s2068_s3 + $0x20] sm:$0xff]  }
 0x5e7   :  { %v975_v7 = vpop.f32.mrf.mxu1  ;;  %v1612_v14 = vld [vmem:[%s2068_s3 + $0x18] sm:$0xff]  }
 0x5e8   :  { %v927_v8 = vpop.f32.mrf.mxu0  ;;  %v1594_v9 = vpack.i.bf16 %v975_v7, %v783_v37 }
 0x5e9   :  { %v1589_v10 = vpack.i.bf16 %v927_v8, %v735_v40  ;;  %v1532_v12 = vpop.f32.mrf.mxu1 }
 0x5ea   :  { %v1526_v17 = vpop.f32.mrf.mxu0  ;;  %1595 = vrot.lane.b32.xlu0 %v1594_v9, %s1686_s8 }
 0x5eb   :  { %1590 = vrot.lane.b32.xlu1 %v1589_v10, %s1687_s9  ;;  %v978_v18 = vpop.f32.mrf.mxu1 }
 0x5ec   :  { %v930_v19 = vpop.f32.mrf.mxu0  ;;  %v1148_v18 = vsub.s32 2, %v1759_v24 }
 0x5ed   :  { %v1533_v47 = vpop.f32.mrf.mxu1 }
 0x5ee   :  { %v1527_v46 = vpop.f32.mrf.mxu0  ;;  %1062 = vrot.lane.b32.xlu0 %v1751_v16, %s1685_s7 }
 0x5ef   :  { %v1149_v46 = vrot.slane %v1765_v26, %v1148_v18 }
 0x5f3   :  { %v1023_v54 = vpop.f32.mrf.mxu0 }
 0x5f4   :  { %v1599_v58 = vpack.i.bf16 %v1023_v54, %v831_v63  ;;  %v1606_v63 = vld [vmem:[%s2067_s2 + $0x8] sm:$0xff]   ;;  %v1154_v54 = vsub.s32 3, %v1759_v24 }
 0x5f5   :  { %v1538_v43 = vpop.f32.mrf.mxu0  ;;  %1549 = vmatpush3.bf16.msra.mxu0 %v1606_v63 }
 0x5f6   :  { %1600 = vrot.lane.b32.xlu1 %v1599_v58, %s1688_s10  ;;  %1550 = vmatprep.subr.bf16.mxu0 %v1678_v15 }
 0x5f7   :  { %v1026_v20 = vpop.f32.mrf.mxu0 }
 0x5f9   :  { %v1539_v13 = vpop.f32.mrf.mxu0  ;;  %1551 = vmatpush3.bf16.msra.mxu0 %v1607_v2 }
 0x5fa   :  { %v1155_v13 = vrot.slane %v1765_v26, %v1154_v54 }
 0x65c   :  { %v1596_v21 = vpop.permute.xlu0 %1595 }
 0x65d   :  { %v1591_v22 = vpop.permute.xlu1 %1590  ;;  %v1598_v29 = vunpack.i.h.bf16 %v1596_v21  ;;  %v1597_v30 = vunpack.i.l.bf16 %v1596_v21 }
 0x65e   :  { %v1593_v27 = vunpack.i.h.bf16 %v1591_v22  ;;  %v1592_v28 = vunpack.i.l.bf16 %v1591_v22 }
 0x660   :  { %v1063_v11 = vpop.permute.xlu0 %1062  ;;  %v1054_v31 = vsel %vm158_vm2, %v879_v62, %v1593_v27  ;;  %v1053_v16 = vsel %vm158_vm2, %v687_v56, %v1592_v28  ;;  %v1613_v28 = vld [vmem:[%s2068_s3 + $0x10] sm:$0xff]  }
 0x661   :  { %1543 = vmatpush3.bf16.msra.mxu1 %v1063_v11  ;;  %v1056_v23 = vsel %vm1055_vm4, %v1053_v16, %v1597_v30  ;;  %v1057_v33 = vsel %vm1055_vm4, %v1054_v31, %v1598_v29  ;;  %v1614_v29 = vld [vmem:[%s2068_s3 + $0x8] sm:$0xff]   ;;  %v1615_v30 = vld [vmem:[%s2068_s3] sm:$0xff]   ;;  %v1165_v31 = vsub.s32 6, %v1759_v24  ;;  %s1689_s3 = smov [#allocation2]  }
 0x662   :  { %1556 = vmatprep.subr.bf16.mxu1 %v1678_v15  ;;  %s1344_s28 = sshll.u32 %s1689_s3, 4  ;;  %s1345_s28 = int_to_ptr.vmem [resolvable:$true] %s1344_s28 }
 0x663   :  { %v1166_v16 = vrot.slane %v1765_v26, %v1165_v31  ;;  %s1656_s29 = scalar_lea.vmem %s1345_s28, 256  ;;  %p1661_p1 = scmp.lt.s32.totalorder %s1345_s28, %s1345_s28 }
 0x664   :  { %p1657_p0 = scmp.ne.s32.totalorder %s1345_s28, %s1656_s29  ;;  %p1662_p2 = scmp.lt.s32.totalorder %s1656_s29, %s1656_s29 }
 0x666   :  { %p1663_p3 = por %p1662_p2, %p1661_p1 }
 0x668   :  { %v1601_v50 = vpop.permute.xlu1 %1600  ;;  %p1664_p4 = pnand %p1663_p3, %p1657_p0 }
 0x669   :  { %v1603_v25 = vunpack.i.h.bf16 %v1601_v50  ;;  %v1602_v32 = vunpack.i.l.bf16 %v1601_v50 }
 0x66b   :  { %v1060_v34 = vsel %vm1058_vm5, %v1057_v33, %v1603_v25  ;;  %v1059_v35 = vsel %vm1058_vm5, %v1056_v23, %v1602_v32 }
 0x66c   :  { %v1061_v36 = vpack.c.bf16 %v1060_v34, %v1059_v35 }
 0x66e   :  { %1545 = vmatmul.mubr.msk.bf16.vlgmr.msra.gmra.mxu1 %vm26_vm0, %v1061_v36 }
 0x66f   :  { %1572 = vmatprep.mubr.msk.bf16.mxu1 %vm1679_vm1, %v1678_v15  ;;  %1557 = vmatpush3.bf16.msra.mxu1 %v1608_v3 }
 0x670   :  { %1558 = vmatprep.subr.bf16.mxu1 %v1678_v15 }
 0x673   :  { %1559 = vmatpush3.bf16.msra.mxu1 %v1609_v4 }
 0x674   :  { %1560 = vmatprep.subr.bf16.mxu1 %v1678_v15 }
 0x677   :  { %1561 = vmatpush3.bf16.msra.mxu1 %v1610_v5 }
 0x678   :  { %1562 = vmatprep.subr.bf16.mxu1 %v1678_v15 }
 0x67b   :  { %1563 = vmatpush3.bf16.msra.mxu1 %v1611_v6 }
 0x67c   :  { %1564 = vmatprep.subr.bf16.mxu1 %v1678_v15 }
 0x67f   :  { %1565 = vmatpush3.bf16.msra.mxu1 %v1612_v14 }
 0x680   :  { %1566 = vmatprep.subr.bf16.mxu1 %v1678_v15 }
 0x683   :  { %1567 = vmatpush3.bf16.msra.mxu1 %v1613_v28 }
 0x684   :  { %1568 = vmatprep.subr.bf16.mxu1 %v1678_v15 }
 0x687   :  { %1569 = vmatpush3.bf16.msra.mxu1 %v1614_v29 }
 0x688   :  { %1570 = vmatprep.subr.bf16.mxu1 %v1678_v15  ;;  %v1244_v15 = vsub.s32 5, %v1759_v24 }
 0x68b   :  { %1571 = vmatpush3.bf16.msra.mxu1 %v1615_v30 }
 0x72e   :  { %v1105_v41 = vpop.f32.mrf.mxu1 }
 0x72f   :  { %v1112_v42 = vadd.f32 %v1105_v41, %v1724_v0 }
 0x730   :  { %v1546_v44 = vpop.f32.mrf.mxu1 }
 0x731   :  { %v1997_v45 = vadd.f32 %v1117_v39, %v1112_v42 }
 0x732   :  { %v1108_v56 = vpop.f32.mrf.mxu1 }
 0x733   :  { %v1113_v48 = vadd.f32 %v1108_v56, %v1729_v1  ;;  %v1120_v51 = vsel %vm26_vm0, %v1997_v45, 0.0 }
 0x734   :  { %1121 = vadd.xlane.f32.xlu1 %v1120_v51  ;;  %v1547_v49 = vpop.f32.mrf.mxu1 }
 0x735   :  { %v2002_v37 = vadd.f32 %v1117_v39, %v1113_v48  ;;  %v1245_v39 = vrot.slane %v1765_v26, %v1244_v15 }
 0x737   :  { %v1123_v40 = vsel %vm26_vm0, %v2002_v37, 0.0 }
 0x738   :  { %1124 = vadd.xlane.f32.xlu0 %v1123_v40 }
 0x7bd   :  { %v1122_v52 = vpop.xlane.xlu1 %1121 }
 0x7be   :  { %v1126_v53 = vmul.f32 0.03125, %v1122_v52 }
 0x7c0   :  { %v1128_v0 = vsub.f32 %v1997_v45, %v1126_v53 }
 0x7c1   :  { %v1125_v55 = vpop.xlane.xlu0 %1124 }
 0x7c2   :  { %v1127_v57 = vmul.f32 0.03125, %v1125_v55  ;;  %v1130_v59 = vmul.f32 %v1128_v0, %v1128_v0 }
 0x7c4   :  { %v1129_v1 = vsub.f32 %v2002_v37, %v1127_v57  ;;  %v1132_v60 = vsel %vm26_vm0, %v1130_v59, 0.0 }
 0x7c5   :  { %1133 = vadd.xlane.f32.xlu0 %v1132_v60 }
 0x7c6   :  { %v1131_v61 = vmul.f32 %v1129_v1, %v1129_v1 }
 0x7c8   :  { %v1135_v62 = vsel %vm26_vm0, %v1131_v61, 0.0 }
 0x7c9   :  { %1136 = vadd.xlane.f32.xlu0 %v1135_v62 }
 0x84e   :  { %v1134_v7 = vpop.xlane.xlu0 %1133 }
 0x84f   :  { %v1138_v8 = vmul.f32 0.03125, %v1134_v7 }
 0x851   :  { %v1140_v9 = vadd.f32 1e-05, %v1138_v8 }
 0x852   :  { %v1137_v10 = vpop.xlane.xlu0 %1136 }
 0x853   :  { %1652 = vrsqrt.f32 %v1140_v9  ;;  %v1139_v12 = vmul.f32 0.03125, %v1137_v10 }
 0x855   :  { %v1141_v17 = vadd.f32 1e-05, %v1139_v12 }
 0x857   :  { %1654 = vrsqrt.f32 %v1141_v17 }
 0x860   :  { %v1653_v19 = vpop.eup %1652 }
 0x861   :  { %v1144_v47 = vmul.f32 %v1653_v19, %v1128_v0 }
 0x863   :  { %v1150_v20 = vmul.f32 %v1149_v46, %v1144_v47 }
 0x864   :  { %v1655_v58 = vpop.eup %1654 }
 0x865   :  { %v1145_v43 = vmul.f32 %v1655_v58, %v1129_v1  ;;  %v1156_v22 = vadd.f32 %v1155_v13, %v1150_v20 }
 0x867   :  { %v1151_v21 = vmul.f32 %v1149_v46, %v1145_v43 }
 0x869   :  { %v1157_v11 = vadd.f32 %v1155_v13, %v1151_v21 }
 0x86b   :  { %v1158_v27 = vpack.c.bf16 %v1157_v11, %v1156_v22 }
 0x86d   :  { %1553 = vmatmul.mubr.msk.bf16.vlgmr.msra.gmra.mxu0 %vm26_vm0, %v1158_v27 }
 0x92d   :  { %v1216_v50 = vpop.f32.mrf.mxu0 }
 0x92e   :  { %v1217_v32 = vadd.f32 %v1216_v50, %v1166_v16 }
 0x92f   :  { %v1554_v25 = vpop.f32.mrf.mxu0 }
 0x930   :  { %v1223_v35 = vmax.f32 %v1217_v32, 0.0 }
 0x931   :  { %v1219_v23 = vpop.f32.mrf.mxu0 }
 0x932   :  { %v1220_v33 = vadd.f32 %v1219_v23, %v1166_v16 }
 0x933   :  { %v1555_v34 = vpop.f32.mrf.mxu0 }
 0x934   :  { %v1224_v36 = vmax.f32 %v1220_v33, 0.0 }
 0x936   :  { %v1225_v38 = vpack.c.bf16 %v1224_v36, %v1223_v35 }
 0x938   :  { %1573 = vmatmul.mubr.bf16.vlgmr.msra.gmra.mxu1 %v1225_v38 }
 0x9f8   :  { %v1328_v41 = vpop.f32.mrf.mxu1 }
 0x9f9   :  { %v1329_v42 = vadd.f32 %v1328_v41, %v1245_v39 }
 0x9fa   :  { %v1574_v44 = vpop.f32.mrf.mxu1 }
 0x9fb   :  { %v1335_v56 = vadd.f32 %v1329_v42, %v1997_v45 }
 0x9fc   :  { %v1331_v48 = vpop.f32.mrf.mxu1 }
 0x9fd   :  { %1337 = vst.msk [vmem:[#allocation2] sm:$0xff] %vm26_vm0, %v1335_v56  ;;  %v1332_v51 = vadd.f32 %v1331_v48, %v1245_v39 }
 0x9fe   :  { %v1575_v49 = vpop.f32.mrf.mxu1 }
 0x9ff   :  { %v1336_v40 = vadd.f32 %v1332_v51, %v2002_v37 }
 0xa01   :  { %1338 = vst.msk [vmem:[#allocation2 + $0x8] sm:$0xff] %vm26_vm0, %v1336_v40 }
 0xa02   :  { %1667 = shalt.err (!%p1664_p4)
}
 0xa03   :  { %s1690_s30 = smov 128  }
 0xa04   :  { %1350 = dma.vmem_to_hbm [thread:$0]  %s1345_s28, 256, %s2070_s5, [#allocation3], %s1690_s30, %s1690_s30, %s1687_s9  }
 0xa05   :  { %1676 = dma.done.wait [#allocation3], 256  }
 0xa06   :  { %1677 = vsyncadd [#allocation3], 4294967040 }
 0xa07   :  { %1354 = vsyncpa [#allocation3], 1 }

</bundles_post_ra>
